<compile_context>
chip_gen: v7x
topology: tpu7x:2x2x1
jax: 0.10.0
libtpu: 0.0.40
codegen_flags: <defaults>
</compile_context>

<pallas_src>
import jax
import jax.numpy as jnp
from jax.experimental import pallas as pl
from jax.experimental.pallas import tpu as pltpu


def _round_up(x, m):
    return (x + m - 1) // m * m


def _choose_tile(m, target):
    """Row-tile size: multiple of 8, >=2 grid steps when possible (v7x 2 TCs)."""
    if m <= 8:
        return m                       # single full block (block dim == array dim)
    tm = _round_up(pl.cdiv(m, 2), 8)   # at most ~half the rows per step
    return min(target, tm)


def _linear_kernel(x_ref, wt_ref, b_ref, o_ref):
    # x_ref : (TILE_M, K) natural-layout input rows
    # wt_ref: (K, N)      = W^T (resident across grid steps)
    # b_ref : (1, N)      bias row (resident, broadcast over rows)
    # o_ref : (TILE_M, N) natural-layout output rows
    y = jnp.dot(
        x_ref[...],
        wt_ref[...],
        preferred_element_type=jnp.float32,
        precision=jax.lax.Precision.HIGHEST,
    )
    o_ref[...] = (y + b_ref[...]).astype(o_ref.dtype)


def model_with_several_transposes(x, w, b, *, target_tile_m=8192):
    """Reproduces ModelWithSeveralTransposes.forward.

    x: (B, C, H, D) with D == 10
    w: (10, 10) PyTorch Linear weight (out_features, in_features)
    b: (10,)    PyTorch Linear bias
    """
    # transpose_1/2 and transpose_3/4 are exact inverses -> identity; dropped.
    B, C, H, D = x.shape
    M = B * C * H

    x2 = x.reshape(M, D)        # free, layout-compatible reshape (no copy pass)
    wt = w.T                    # (in, out); 400-byte one-time op
    b2 = b.reshape(1, D)

    tm = _choose_tile(M, target_tile_m)
    grid_m = pl.cdiv(M, tm)     # ragged last tile handled by masked edge block

    y2 = pl.pallas_call(
        _linear_kernel,
        out_shape=jax.ShapeDtypeStruct((M, D), x.dtype),
        grid_spec=pl.GridSpec(
            grid=(grid_m,),
            in_specs=[
                pl.BlockSpec((tm, D), lambda i: (i, 0)),   # x row tiles
                pl.BlockSpec((D, D), lambda i: (0, 0)),    # W^T (resident)
                pl.BlockSpec((1, D), lambda i: (0, 0)),    # bias row (resident)
            ],
            out_specs=pl.BlockSpec((tm, D), lambda i: (i, 0)),
        ),
        compiler_params=pltpu.CompilerParams(
            dimension_semantics=("parallel",),   # row tiles independent -> v7x 2x TC
            vmem_limit_bytes=32 << 20,           # headroom for large tiles on v5e
        ),
        cost_estimate=pl.CostEstimate(
            flops=2 * M * D * D,
            transcendentals=0,
            bytes_accessed=(2 * M * D + D * D + D) * 4,
        ),
    )(x2, wt, b2)

    return y2.reshape(B, C, H, D)


if __name__ == "__main__":
    key = jax.random.PRNGKey(0)
    kx, kw, kb = jax.random.split(key, 3)

    # Small shapes consistent with the module: Linear(10, 10) => last dim 10.
    B, C, H, D = 2, 4, 16, 10
    x = jax.random.normal(kx, (B, C, H, D), dtype=jnp.float32)

    # PyTorch Linear parameter shapes: W (out=10, in=10), b (10,).
    w = jax.random.normal(kw, (D, D), dtype=jnp.float32) * 0.1
    b = jax.random.normal(kb, (D,), dtype=jnp.float32) * 0.1

    fwd = jax.jit(model_with_several_transposes)
    out = jax.block_until_ready(fwd(x, w, b))

    # Pure-JAX reference (transposes cancel; Linear on last axis).
    ref = jnp.einsum("bchd,nd->bchn", x, w,
                     precision=jax.lax.Precision.HIGHEST) + b
    assert out.shape == (B, C, H, D)
    assert jnp.allclose(out, ref, atol=1e-5, rtol=1e-5)

    print("KERNEL_OK")
</pallas_src>

<mosaic_0001>
module attributes {stable_mosaic.version = 11 : i64} {
  func.func @_linear_kernel(%arg0: i32, %arg1: memref<64x10xf32, #tpu.memory_space<vmem>>, %arg2: memref<10x10xf32, #tpu.memory_space<vmem>>, %arg3: memref<1x10xf32, #tpu.memory_space<vmem>>, %arg4: memref<64x10xf32, #tpu.memory_space<vmem>>) attributes {dimension_semantics = [#tpu.dimension_semantics<parallel>], iteration_bounds = array<i64: 2>, scalar_prefetch = 0 : i64, scratch_operands = 0 : i64, tpu.core_type = #tpu.core_type<tc>, window_params = [{transform_indices = @transform_0, window_bounds = array<i64: 64, 10>}, {pipeline_mode = #tpu.pipeline_mode<synchronous>, transform_indices = @transform_1, window_bounds = array<i64: 10, 10>}, {pipeline_mode = #tpu.pipeline_mode<synchronous>, transform_indices = @transform_2, window_bounds = array<i64: 1, 10>}, {transform_indices = @transform_3, window_bounds = array<i64: 64, 10>}]} {
    %c0 = arith.constant 0 : index
    %c0_0 = arith.constant 0 : index
    %0 = vector.load %arg1[%c0, %c0_0] : memref<64x10xf32, #tpu.memory_space<vmem>>, vector<64x10xf32>
    %c0_1 = arith.constant 0 : index
    %c0_2 = arith.constant 0 : index
    %1 = vector.load %arg2[%c0_1, %c0_2] : memref<10x10xf32, #tpu.memory_space<vmem>>, vector<10x10xf32>
    %cst = arith.constant dense<0.000000e+00> : vector<64x10xf32>
    %2 = tpu.matmul %0, %1, %cst {dimension_numbers = #tpu.dot_dimension_numbers<[1], [0], [0], [1], [0, 0, 1, 1], [], []>, precision = #tpu.contract_precision<fp32>} : vector<64x10xf32>, vector<10x10xf32>, vector<64x10xf32> -> vector<64x10xf32>
    %c0_3 = arith.constant 0 : index
    %c0_4 = arith.constant 0 : index
    %3 = vector.load %arg3[%c0_3, %c0_4] : memref<1x10xf32, #tpu.memory_space<vmem>>, vector<1x10xf32>
    %4 = vector.broadcast %3 : vector<1x10xf32> to vector<64x10xf32>
    %5 = arith.addf %2, %4 : vector<64x10xf32>
    %c0_5 = arith.constant 0 : index
    %c0_6 = arith.constant 0 : index
    %6 = vector.load %arg4[%c0_5, %c0_6] : memref<64x10xf32, #tpu.memory_space<vmem>>, vector<64x10xf32>
    tpu.vector_store %arg4[%c0_5, %c0_6], %5 {strides = array<i32>} : memref<64x10xf32, #tpu.memory_space<vmem>>, vector<64x10xf32>,
    return
  }
  func.func @transform_0(%arg0: i32) -> (i32, i32) {
    %c0_i32 = arith.constant 0 : i32
    %c0_i32_0 = arith.constant 0 : i32
    return %arg0, %c0_i32 : i32, i32
  }
  func.func @transform_1(%arg0: i32) -> (i32, i32) {
    %c0_i32 = arith.constant 0 : i32
    %c0_i32_0 = arith.constant 0 : i32
    %c0_i32_1 = arith.constant 0 : i32
    return %c0_i32, %c0_i32_0 : i32, i32
  }
  func.func @transform_2(%arg0: i32) -> (i32, i32) {
    %c0_i32 = arith.constant 0 : i32
    %c0_i32_0 = arith.constant 0 : i32
    %c0_i32_1 = arith.constant 0 : i32
    return %c0_i32, %c0_i32_0 : i32, i32
  }
  func.func @transform_3(%arg0: i32) -> (i32, i32) {
    %c0_i32 = arith.constant 0 : i32
    %c0_i32_0 = arith.constant 0 : i32
    return %arg0, %c0_i32 : i32, i32
  }
}

</mosaic_0001>

<bundles_post_ra>
// kernel: model_with_several_transposes.1
= control target key start
LH: loop header
LB: loop body
LE: loop exit
PB: predicated region body
PF: predicated region fallthrough
CT: control target
= control target key end

     0   :  { %s1320_s12 = smov 0   ;;  %s1474_s0 = inlined_call_operand.vmem [shape: f32[128,10], index: 0, kind: input, shape index: {}]   ;;  %s1475_s1 = inlined_call_operand.vmem [shape: f32[10,10], index: 1, kind: input, shape index: {}]   ;;  %s1476_s2 = inlined_call_operand.vmem [shape: f32[1,10], index: 2, kind: input, shape index: {}]   ;;  %s1477_s3 = inlined_call_operand.vmem [shape: f32[128,10], index: 3, kind: output, shape index: {}]  }
   0x1 LB: > { %s1044_s13 = sadd.s32 4294967295, %s1298_s12   ;;  %p1048_p0 = scmp.ge.s32.totalorder %s1298_s12, 1  ;;  %s1298_s12 = sphi %s1320_s12, %s13_s12  }
   0x2   : > { %p138_p1 = scmp.lt.s32.totalorder %s1298_s12, 3 }
   0x4   : > { %p139_p2 = pnand %p1048_p0, %p138_p1 }
   0x5   : > { %v182_v0 = vld [vmem:[%s1475_s1] sm:$0xff] (!%p139_p2)  ;;  %v183_v1 = vld [vmem:[%s1475_s1 + $0x8] sm:$0x3] (!%p139_p2)  ;;  %vm216_vm0 = vcmask (!%p139_p2), 1041408   ;;  %s1049_s18 = sshll.u32 (!%p139_p2), %s1044_s13, 3  ;;  %vm191_vm1 = vcmask (!%p139_p2), 80896  }
   0x6   : > { %142 = sbr.rel (%p139_p2) target bundleno = 291 (0x123), region = 32  ;;  %v218_v2 = vsel (!%p139_p2), %vm216_vm0, %v183_v1, 0  ;;  %v221_v3 = vand.u32 (!%p139_p2), 4294901760, %v182_v0  ;;  %p163_p3 = scmp.lt.s32.totalorder (!%p139_p2), %s1049_s18, 15 }
   0x7   : > { %v224_v4 = vand.u32 (!%p139_p2), 4294901760, %v218_v2 }
   0x8   : > { %v369_v5 = vsub.f32 (!%p139_p2), %v182_v0, %v221_v3 }
   0x9   : > { %v1336_v6 = vpack.c.bf16 (!%p139_p2), %v224_v4, %v221_v3  ;;  %v376_v7 = vsub.f32 (!%p139_p2), %v218_v2, %v224_v4 }
   0xa   : > { %v370_v8 = vand.u32 (!%p139_p2), 4294901760, %v369_v5 }
   0xb   : > { %1225 = vmatprep.subr.bf16.mxu0 (!%p139_p2), %v1336_v6  ;;  %1213 = vmatprep.subr.bf16.mxu1 (!%p139_p2), %v1336_v6  ;;  %v377_v9 = vand.u32 (!%p139_p2), 4294901760, %v376_v7  ;;  %v1348_v14 = vpack.c.bf16 (!%p139_p2), %v376_v7, %v369_v5 }
   0xc   : > { %1227 = vmatpush3.bf16.msra.mxu0 (!%p139_p2), %v1336_v6  ;;  %1215 = vmatpush3.bf16.msra.mxu1 (!%p139_p2), %v1336_v6  ;;  %v371_v12 = vsub.f32 (!%p139_p2), %v369_v5, %v370_v8 }
   0xd   : > { %s1479_s18 = smov (!%p163_p3, %s1049_s18), 15  ;;  %v378_v17 = vsub.f32 %v376_v7, %v377_v9  ;;  %v1228_v29 = vpack.c.bf16 %v377_v9, %v370_v8 }
   0xe   : > { %s1050_s19 = sshll.u32 %s1479_s18, 3  ;;  %v372_v23 = vand.u32 4294901760, %v371_v12 }
   0xf   : > { %s166_s22 = scalar_lea.vmem %s1474_s0, %s1050_s19  ;;  %v379_v27 = vand.u32 4294901760, %v378_v17  ;;  %1229 = vmatprep.subr.bf16.mxu0 %v1228_v29  ;;  %s1453_s27 = scalar_lea.vmem %s1477_s3, %s1050_s19 }
  0x10   : > { %v174_v10 = vld [vmem:[%s166_s22] sm:$0xff]  ;;  %v175_v11 = vld [vmem:[%s166_s22 + $0x8] sm:$0xff]  ;;  %v176_v13 = vld [vmem:[%s166_s22 + $0x10] sm:$0xff] }
  0x11   : > { %v193_v15 = vsel %vm191_vm1, %v174_v10, 0  ;;  %v196_v16 = vsel %vm191_vm1, %v175_v11, 0  ;;  %v199_v18 = vsel %vm191_vm1, %v176_v13, 0  ;;  %v177_v19 = vld [vmem:[%s166_s22 + $0x18] sm:$0xff]  ;;  %v178_v20 = vld [vmem:[%s166_s22 + $0x20] sm:$0xff]  ;;  %v179_v25 = vld [vmem:[%s166_s22 + $0x28] sm:$0xff]  ;;  %v1216_v36 = vpack.c.bf16 %v379_v27, %v372_v23 }
  0x12   : > { %v1353_v21 = vand.u32 4294901760, %v193_v15  ;;  %v1355_v22 = vand.u32 4294901760, %v196_v16  ;;  %v1357_v24 = vand.u32 4294901760, %v199_v18  ;;  %v180_v26 = vld [vmem:[%s166_s22 + $0x30] sm:$0xff]  ;;  %v202_v28 = vsel %vm191_vm1, %v177_v19, 0  ;;  %v181_v35 = vld [vmem:[%s166_s22 + $0x38] sm:$0xff] }
  0x13   : > { %v205_v30 = vsel %vm191_vm1, %v178_v20, 0  ;;  %v1370_v34 = vand.u32 4294901760, %v202_v28  ;;  %v208_v38 = vsel %vm191_vm1, %v179_v25, 0  ;;  %v211_v39 = vsel %vm191_vm1, %v180_v26, 0  ;;  %1217 = vmatprep.subr.bf16.mxu1 %v1216_v36  ;;  %v1053_v11 = vld [vmem:[%s1476_s2] ss:$0 sm:$0xff] }
  0x14   : > { %v1362_v31 = vsub.f32 %v193_v15, %v1353_v21  ;;  %v1365_v32 = vsub.f32 %v196_v16, %v1355_v22  ;;  %v1368_v33 = vsub.f32 %v199_v18, %v1357_v24  ;;  %v1372_v37 = vand.u32 4294901760, %v205_v30 }
  0x15   : > { %v1380_v43 = vsub.f32 %v202_v28, %v1370_v34  ;;  %v1385_v45 = vand.u32 4294901760, %v208_v38  ;;  %v1387_v46 = vand.u32 4294901760, %v211_v39  ;;  %v214_v47 = vsel %vm191_vm1, %v181_v35, 0 }
  0x16   : > { %v289_v40 = vand.u32 4294901760, %v1362_v31  ;;  %v299_v41 = vand.u32 4294901760, %v1365_v32  ;;  %v309_v42 = vand.u32 4294901760, %v1368_v33  ;;  %v1383_v44 = vsub.f32 %v205_v30, %v1372_v37 }
  0x17   : > { %v319_v50 = vand.u32 4294901760, %v1380_v43  ;;  %v1396_v53 = vsub.f32 %v208_v38, %v1385_v45  ;;  %v1399_v54 = vsub.f32 %v211_v39, %v1387_v46  ;;  %v1401_v55 = vand.u32 4294901760, %v214_v47 }
  0x18   : > { %1168 = vmatprep.mubr.f32.mxu0 %v289_v40  ;;  %v290_v48 = vsub.f32 %v1362_v31, %v289_v40  ;;  %v300_v49 = vsub.f32 %v1365_v32, %v299_v41  ;;  %v310_v51 = vsub.f32 %v1368_v33, %v309_v42  ;;  %v329_v52 = vand.u32 4294901760, %v1383_v44 }
  0x19   : > { %1169 = vmatmul.mubr.f32.vlgmr.msra.gmra.mrb[0].mxu0 %v299_v41  ;;  %v320_v59 = vsub.f32 %v1380_v43, %v319_v50  ;;  %v339_v60 = vand.u32 4294901760, %v1396_v53  ;;  %v349_v62 = vand.u32 4294901760, %v1399_v54  ;;  %v358_v63 = vsub.f32 %v214_v47, %v1401_v55 }
  0x1a   : > { %v291_v56 = vand.u32 4294901760, %v290_v48  ;;  %1171 = vmatprep.mubr.f32.mxu0 %v309_v42  ;;  %v301_v57 = vand.u32 4294901760, %v300_v49  ;;  %1231 = vmatpush3.bf16.msra.mxu0 %v1228_v29  ;;  %v311_v58 = vand.u32 4294901760, %v310_v51  ;;  %v330_v61 = vsub.f32 %v1383_v44, %v329_v52 }
  0x1b   : > { %1233 = vmatprep.subr.bf16.mxu0 %v1336_v6  ;;  %v321_v0 = vand.u32 4294901760, %v320_v59  ;;  %v340_v1 = vsub.f32 %v1396_v53, %v339_v60  ;;  %v359_v2 = vand.u32 4294901760, %v358_v63  ;;  %v350_v4 = vsub.f32 %v1399_v54, %v349_v62 }
  0x1c   : > { %1120 = vmatprep.mubr.f32.mxu1 %v291_v56  ;;  %v331_v3 = vand.u32 4294901760, %v330_v61 }
  0x1d   : > { %1121 = vmatmul.mubr.f32.vlgmr.msra.gmra.mrb[0].mxu1 %v301_v57  ;;  %1172 = vmatmul.mubr.f32.gmra.mrb[2].mxu0 %v319_v50  ;;  %v341_v5 = vand.u32 4294901760, %v340_v1  ;;  %v360_v7 = vsub.f32 %v358_v63, %v359_v2  ;;  %v351_v8 = vand.u32 4294901760, %v350_v4 }
  0x1e   : > { %1219 = vmatpush3.bf16.msra.mxu1 %v1216_v36  ;;  %1123 = vmatprep.mubr.f32.mxu1 %v311_v58 }
  0x1f   : > { %1174 = vmatprep.mubr.f32.mxu0 %v329_v52  ;;  %1221 = vmatprep.subr.bf16.mxu1 %v1348_v14  ;;  %v361_v9 = vand.u32 4294901760, %v360_v7 }
  0x21   : > { %1124 = vmatmul.mubr.f32.gmra.mrb[2].mxu1 %v321_v0  ;;  %1175 = vmatmul.mubr.f32.gmra.mrb[4].mxu0 %v339_v60 }
  0x22   : > { %1126 = vmatprep.mubr.f32.mxu1 %v331_v3  ;;  %1177 = vmatprep.mubr.f32.mxu0 %v349_v62 }
  0x25   : > { %1127 = vmatmul.mubr.f32.gmra.mrb[4].mxu1 %v341_v5  ;;  %1178 = vmatmul.mubr.f32.gmra.mrb[6].mxu0 %v359_v2 }
  0x26   : > { %1129 = vmatprep.mubr.f32.mxu1 %v351_v8  ;;  %1184 = vmatprep.mubr.f32.mxu0 %v1353_v21 }
  0x29   : > { %1130 = vmatmul.mubr.f32.gmra.mrb[6].mxu1 %v361_v9  ;;  %1185 = vmatmul.mubr.f32.vlgmr.msra.gmra.mrb[0].mxu0 %v1355_v22 }
  0x2a   : > { %1136 = vmatprep.mubr.f32.mxu1 %v1353_v21  ;;  %1187 = vmatprep.mubr.f32.mxu0 %v1357_v24 }
  0x2b   : > { %1235 = vmatpush3.bf16.msra.mxu0 %v1336_v6 }
  0x2d   : > { %1137 = vmatmul.mubr.f32.vlgmr.msra.gmra.mrb[0].mxu1 %v1355_v22  ;;  %1188 = vmatmul.mubr.f32.gmra.mrb[2].mxu0 %v1370_v34 }
  0x2e   : > { %1223 = vmatpush3.bf16.msra.mxu1 %v1348_v14  ;;  %1139 = vmatprep.mubr.f32.mxu1 %v1357_v24 }
  0x2f   : > { %1190 = vmatprep.mubr.f32.mxu0 %v1372_v37 }
  0x31   : > { %1140 = vmatmul.mubr.f32.gmra.mrb[2].mxu1 %v1370_v34  ;;  %1191 = vmatmul.mubr.f32.gmra.mrb[4].mxu0 %v1385_v45 }
  0x32   : > { %1142 = vmatprep.mubr.f32.mxu1 %v1372_v37  ;;  %1193 = vmatprep.mubr.f32.mxu0 %v1387_v46 }
  0x35   : > { %1143 = vmatmul.mubr.f32.gmra.mrb[4].mxu1 %v1385_v45  ;;  %1194 = vmatmul.mubr.f32.gmra.mrb[6].mxu0 %v1401_v55 }
  0x36   : > { %1145 = vmatprep.mubr.f32.mxu1 %v1387_v46  ;;  %1200 = vmatprep.mubr.f32.mxu0 %v1353_v21 }
  0x39   : > { %1146 = vmatmul.mubr.f32.gmra.mrb[6].mxu1 %v1401_v55  ;;  %1201 = vmatmul.mubr.f32.vlgmr.msra.gmra.mrb[0].mxu0 %v1355_v22 }
  0x3a   : > { %1152 = vmatprep.mubr.f32.mxu1 %v1362_v31  ;;  %1203 = vmatprep.mubr.f32.mxu0 %v1357_v24 }
  0x3d   : > { %1153 = vmatmul.mubr.f32.vlgmr.msra.gmra.mrb[0].mxu1 %v1365_v32  ;;  %1204 = vmatmul.mubr.f32.gmra.mrb[2].mxu0 %v1370_v34 }
  0x3e   : > { %1155 = vmatprep.mubr.f32.mxu1 %v1368_v33  ;;  %1206 = vmatprep.mubr.f32.mxu0 %v1372_v37 }
  0x41   : > { %1156 = vmatmul.mubr.f32.gmra.mrb[2].mxu1 %v1380_v43  ;;  %1207 = vmatmul.mubr.f32.gmra.mrb[4].mxu0 %v1385_v45 }
  0x42   : > { %1158 = vmatprep.mubr.f32.mxu1 %v1383_v44  ;;  %1209 = vmatprep.mubr.f32.mxu0 %v1387_v46 }
  0x45   : > { %1159 = vmatmul.mubr.f32.gmra.mrb[4].mxu1 %v1396_v53  ;;  %1210 = vmatmul.mubr.f32.gmra.mrb[6].mxu0 %v1401_v55 }
  0x46   : > { %1161 = vmatprep.mubr.f32.mxu1 %v1399_v54 }
  0x49   : > { %1162 = vmatmul.mubr.f32.gmra.mrb[6].mxu1 %v358_v63 }
 0x10c   : > { %v1202_v6 = vpop.f32.mrb[0].mxu0 }
 0x10d   : > { %v934_v10 = vpop.f32.mrb[1].mxu0 }
 0x110   : > { %v1154_v12 = vpop.f32.mrb[0].mxu1  ;;  %v1205_v13 = vpop.f32.mrb[2].mxu0 }
 0x111   : > { %v1236_v14 = vadd.f32 %v1154_v12, %v1053_v11  ;;  %v562_v15 = vpop.f32.mrb[1].mxu1  ;;  %v946_v16 = vpop.f32.mrb[3].mxu0 }
 0x112   : > { %v1238_v17 = vadd.f32 %v1053_v11, %v562_v15 }
 0x113   : > { %v1237_v18 = vadd.f32 %v1236_v14, %v1202_v6 }
 0x114   : > { %v1239_v19 = vadd.f32 %v1238_v17, %v934_v10  ;;  %v1157_v20 = vpop.f32.mrb[2].mxu1  ;;  %v1208_v21 = vpop.f32.mrb[4].mxu0 }
 0x115   : > { %981 = vst.msk [vmem:[%s1453_s27 + $0x8] sm:$0xff] %vm191_vm1, %v1237_v18  ;;  %v1240_v22 = vadd.f32 %v1157_v20, %v1053_v11  ;;  %v576_v23 = vpop.f32.mrb[3].mxu1  ;;  %v958_v24 = vpop.f32.mrb[5].mxu0 }
 0x116   : > { %980 = vst.msk [vmem:[%s1453_s27] sm:$0xff] %vm191_vm1, %v1239_v19  ;;  %v1242_v25 = vadd.f32 %v1053_v11, %v576_v23 }
 0x117   : > { %v1241_v26 = vadd.f32 %v1240_v22, %v1205_v13 }
 0x118   : > { %v1243_v27 = vadd.f32 %v1242_v25, %v946_v16  ;;  %v1160_v28 = vpop.f32.mrb[4].mxu1  ;;  %v1211_v29 = vpop.f32.mrb[6].mxu0 }
 0x119   : > { %983 = vst.msk [vmem:[%s1453_s27 + $0x18] sm:$0xff] %vm191_vm1, %v1241_v26  ;;  %v1244_v30 = vadd.f32 %v1160_v28, %v1053_v11  ;;  %v590_v31 = vpop.f32.mrb[5].mxu1  ;;  %v970_v32 = vpop.f32.mrb[7].mxu0 }
 0x11a   : > { %982 = vst.msk [vmem:[%s1453_s27 + $0x10] sm:$0xff] %vm191_vm1, %v1243_v27  ;;  %v1246_v33 = vadd.f32 %v1053_v11, %v590_v31 }
 0x11b   : > { %v1245_v34 = vadd.f32 %v1244_v30, %v1208_v21 }
 0x11c   : > { %v1247_v35 = vadd.f32 %v1246_v33, %v958_v24  ;;  %v1163_v36 = vpop.f32.mrb[6].mxu1 }
 0x11d   : > { %985 = vst.msk [vmem:[%s1453_s27 + $0x28] sm:$0xff] %vm191_vm1, %v1245_v34  ;;  %v1248_v37 = vadd.f32 %v1163_v36, %v1053_v11  ;;  %v604_v38 = vpop.f32.mrb[7].mxu1 }
 0x11e   : > { %984 = vst.msk [vmem:[%s1453_s27 + $0x20] sm:$0xff] %vm191_vm1, %v1247_v35  ;;  %v1250_v39 = vadd.f32 %v1053_v11, %v604_v38 }
 0x11f   : > { %v1249_v40 = vadd.f32 %v1248_v37, %v1211_v29 }
 0x120   : > { %v1251_v41 = vadd.f32 %v1250_v39, %v970_v32 }
 0x121   : > { %987 = vst.msk [vmem:[%s1453_s27 + $0x38] sm:$0xff] %vm191_vm1, %v1249_v40 }
 0x122   : > { %986 = vst.msk [vmem:[%s1453_s27 + $0x30] sm:$0xff] %vm191_vm1, %v1251_v41 }
 0x123 PF: > { %s13_s12 = sadd.s32 1, %s1298_s12  }
 0x124   : > { %p10_p4 = scmp.ge.s32.totalorder %s13_s12, 4  }
 0x126   :  { %12 = sbr.rel (!%p10_p4) target bundleno = 1 (0x1), region = 62 }

</bundles_post_ra>
